<compile_context>
chip_gen: v5e
topology: v5e:2x2
jax: 0.10.0
libtpu: 0.0.40
codegen_flags: <defaults>
</compile_context>

<pallas_src>
import jax
import jax.numpy as jnp
from jax.experimental import pallas as pl
from jax.experimental.pallas import tpu as pltpu


def _linear_t_kernel(xT_ref, w_ref, b_ref, oT_ref):
    """out_T = W @ x_T + b, unrolled as a VPU madd chain.

    xT_ref : [F, Bt]  VMEM   (batch on the lane axis -> lane-dense stores)
    w_ref  : [O, F]   SMEM   (PyTorch nn.Linear weight layout, scalar reads)
    b_ref  : [O]      SMEM
    oT_ref : [O, Bt]  VMEM
    """
    n_features = xT_ref.shape[0]
    n_out = oT_ref.shape[0]
    for o in range(n_out):                      # O = 1 here; static unroll
        acc = xT_ref[0:1, :] * w_ref[o, 0]
        for k in range(1, n_features):          # F = 6; static unroll, VPU madds
            acc = acc + xT_ref[k:k + 1, :] * w_ref[o, k]
        oT_ref[o:o + 1, :] = acc + b_ref[o]


def insurance_model_forward(x, weight, bias, *, batch_tile=512):
    """InsuranceModel.forward: out = x @ weight.T + bias.

    x:      [batch, input_size]        float32
    weight: [output_size, input_size]  float32 (PyTorch Linear convention)
    bias:   [output_size]              float32
    returns [batch, output_size]       float32
    """
    assert batch_tile % 128 == 0, "batch_tile must be a multiple of 128 (lane width)"

    x = jnp.asarray(x, jnp.float32)
    weight = jnp.asarray(weight, jnp.float32)
    bias = jnp.asarray(bias, jnp.float32)

    batch, n_features = x.shape
    n_out = weight.shape[0]

    # Transposed problem so the kernel output is lane-dense (layout plumbing only).
    x_t = x.T                                   # [F, B]

    smem = pltpu.MemorySpace.SMEM
    vmem = pltpu.MemorySpace.VMEM

    if batch <= batch_tile:
        # Small / overhead-bound regime: single call, no grid, no MXU.
        out_t = pl.pallas_call(
            _linear_t_kernel,
            out_shape=jax.ShapeDtypeStruct((n_out, batch), jnp.float32),
            in_specs=[
                pl.BlockSpec(memory_space=vmem),   # x_T  (full array)
                pl.BlockSpec(memory_space=smem),   # weight [O, F]
                pl.BlockSpec(memory_space=smem),   # bias   [O]
            ],
            out_specs=pl.BlockSpec(memory_space=vmem),
        )(x_t, weight, bias)
        return out_t.T                          # [B, O]

    # Large-batch regime: tile the (lane) batch axis, parallel across TCs on v7x.
    n_tiles = pl.cdiv(batch, batch_tile)
    batch_pad = n_tiles * batch_tile
    if batch_pad != batch:
        x_t = jnp.pad(x_t, ((0, 0), (0, batch_pad - batch)))

    out_t = pl.pallas_call(
        _linear_t_kernel,
        out_shape=jax.ShapeDtypeStruct((n_out, batch_pad), jnp.float32),
        grid=(n_tiles,),
        in_specs=[
            pl.BlockSpec((n_features, batch_tile), lambda i: (0, i)),
            pl.BlockSpec(memory_space=smem),       # weight, whole array in SMEM
            pl.BlockSpec(memory_space=smem),       # bias,   whole array in SMEM
        ],
        out_specs=pl.BlockSpec((n_out, batch_tile), lambda i: (0, i)),
        compiler_params=pltpu.CompilerParams(
            dimension_semantics=("parallel",),      # v7x megacore; no-op on v5e/v6e
        ),
    )(x_t, weight, bias)
    return out_t[:, :batch].T                   # drop padding, back to [B, O]


if __name__ == "__main__":
    # input_size = 6 numeric features after customize_dataset drops 'region'/'charges';
    # output_size = 1 ('charges').  DataLoader batch_size in the original is 128.
    input_size = 6
    output_size = 1

    key = jax.random.PRNGKey(0)
    kw, kb, kx1, kx2 = jax.random.split(key, 4)

    weight = jax.random.normal(kw, (output_size, input_size), dtype=jnp.float32) * 0.1
    bias = jax.random.normal(kb, (output_size,), dtype=jnp.float32) * 0.1

    # Path 1: small batch (gridless, SMEM scalars, lane-dense [1, 128] output).
    x_small = jax.random.normal(kx1, (128, input_size), dtype=jnp.float32)
    out_small = jax.block_until_ready(insurance_model_forward(x_small, weight, bias))
    ref_small = jnp.dot(x_small, weight.T, precision=jax.lax.Precision.HIGHEST) + bias
    assert out_small.shape == (128, output_size)
    assert jnp.allclose(out_small, ref_small, atol=1e-5, rtol=1e-5)

    # Path 2: larger batch exercising the tiled / padded / parallel-grid path.
    x_big = jax.random.normal(kx2, (1000, input_size), dtype=jnp.float32)
    out_big = jax.block_until_ready(insurance_model_forward(x_big, weight, bias))
    ref_big = jnp.dot(x_big, weight.T, precision=jax.lax.Precision.HIGHEST) + bias
    assert out_big.shape == (1000, output_size)
    assert jnp.allclose(out_big, ref_big, atol=1e-5, rtol=1e-5)

    # TODO(synk): dataset prep (pandas), DataLoader batching, and L1-loss
    # training/eval loops are host-side and intentionally not kernelized.
    print("KERNEL_OK")
</pallas_src>

<mosaic_0001>
module attributes {stable_mosaic.version = 11 : i64} {
  func.func @_linear_t_kernel(%arg0: memref<6x128xf32, #tpu.memory_space<vmem>>, %arg1: memref<1x6xf32, #tpu.memory_space<smem>>, %arg2: memref<1xf32, #tpu.memory_space<smem>>, %arg3: memref<1x128xf32, #tpu.memory_space<vmem>>) attributes {dimension_semantics = [], scalar_prefetch = 0 : i64, scratch_operands = 0 : i64, tpu.core_type = #tpu.core_type<tc>} {
    %c0 = arith.constant 0 : index
    %c0_0 = arith.constant 0 : index
    %0 = vector.load %arg0[%c0, %c0_0] : memref<6x128xf32, #tpu.memory_space<vmem>>, vector<1x128xf32>
    %c0_1 = arith.constant 0 : index
    %c0_2 = arith.constant 0 : index
    %1 = memref.load %arg1[%c0_1, %c0_2] : memref<1x6xf32, #tpu.memory_space<smem>>
    %2 = vector.broadcast %1 : f32 to vector<1x128xf32>
    %3 = arith.mulf %0, %2 : vector<1x128xf32>
    %c1 = arith.constant 1 : index
    %c0_3 = arith.constant 0 : index
    %4 = vector.load %arg0[%c1, %c0_3] : memref<6x128xf32, #tpu.memory_space<vmem>>, vector<1x128xf32>
    %c0_4 = arith.constant 0 : index
    %c1_5 = arith.constant 1 : index
    %5 = memref.load %arg1[%c0_4, %c1_5] : memref<1x6xf32, #tpu.memory_space<smem>>
    %6 = vector.broadcast %5 : f32 to vector<1x128xf32>
    %7 = arith.mulf %4, %6 : vector<1x128xf32>
    %8 = arith.addf %3, %7 : vector<1x128xf32>
    %c2 = arith.constant 2 : index
    %c0_6 = arith.constant 0 : index
    %9 = vector.load %arg0[%c2, %c0_6] : memref<6x128xf32, #tpu.memory_space<vmem>>, vector<1x128xf32>
    %c0_7 = arith.constant 0 : index
    %c2_8 = arith.constant 2 : index
    %10 = memref.load %arg1[%c0_7, %c2_8] : memref<1x6xf32, #tpu.memory_space<smem>>
    %11 = vector.broadcast %10 : f32 to vector<1x128xf32>
    %12 = arith.mulf %9, %11 : vector<1x128xf32>
    %13 = arith.addf %8, %12 : vector<1x128xf32>
    %c3 = arith.constant 3 : index
    %c0_9 = arith.constant 0 : index
    %14 = vector.load %arg0[%c3, %c0_9] : memref<6x128xf32, #tpu.memory_space<vmem>>, vector<1x128xf32>
    %c0_10 = arith.constant 0 : index
    %c3_11 = arith.constant 3 : index
    %15 = memref.load %arg1[%c0_10, %c3_11] : memref<1x6xf32, #tpu.memory_space<smem>>
    %16 = vector.broadcast %15 : f32 to vector<1x128xf32>
    %17 = arith.mulf %14, %16 : vector<1x128xf32>
    %18 = arith.addf %13, %17 : vector<1x128xf32>
    %c4 = arith.constant 4 : index
    %c0_12 = arith.constant 0 : index
    %19 = vector.load %arg0[%c4, %c0_12] : memref<6x128xf32, #tpu.memory_space<vmem>>, vector<1x128xf32>
    %c0_13 = arith.constant 0 : index
    %c4_14 = arith.constant 4 : index
    %20 = memref.load %arg1[%c0_13, %c4_14] : memref<1x6xf32, #tpu.memory_space<smem>>
    %21 = vector.broadcast %20 : f32 to vector<1x128xf32>
    %22 = arith.mulf %19, %21 : vector<1x128xf32>
    %23 = arith.addf %18, %22 : vector<1x128xf32>
    %c5 = arith.constant 5 : index
    %c0_15 = arith.constant 0 : index
    %24 = vector.load %arg0[%c5, %c0_15] : memref<6x128xf32, #tpu.memory_space<vmem>>, vector<1x128xf32>
    %c0_16 = arith.constant 0 : index
    %c5_17 = arith.constant 5 : index
    %25 = memref.load %arg1[%c0_16, %c5_17] : memref<1x6xf32, #tpu.memory_space<smem>>
    %26 = vector.broadcast %25 : f32 to vector<1x128xf32>
    %27 = arith.mulf %24, %26 : vector<1x128xf32>
    %28 = arith.addf %23, %27 : vector<1x128xf32>
    %c0_18 = arith.constant 0 : index
    %29 = memref.load %arg2[%c0_18] : memref<1xf32, #tpu.memory_space<smem>>
    %30 = vector.broadcast %29 : f32 to vector<1x128xf32>
    %31 = arith.addf %28, %30 : vector<1x128xf32>
    %c0_19 = arith.constant 0 : index
    %c0_20 = arith.constant 0 : index
    %32 = vector.load %arg3[%c0_19, %c0_20] : memref<1x128xf32, #tpu.memory_space<vmem>>, vector<1x128xf32>
    tpu.vector_store %arg3[%c0_19, %c0_20], %31 {strides = array<i32>} : memref<1x128xf32, #tpu.memory_space<vmem>>, vector<1x128xf32>,
    return
  }
}

</mosaic_0001>

<bundles_post_ra>
// kernel: tpu_custom_call.1
= control target key start
LH: loop header
LB: loop body
LE: loop exit
PB: predicated region body
PF: predicated region fallthrough
CT: control target
= control target key end

     0   :  { %9 = vsyncpa [#allocation4], 0  ;;  %s203_s0 = inlined_call_operand.hbm [shape: f32[6,128], index: 0, kind: input, shape index: {}]   ;;  %s204_s1 = inlined_call_operand.vmem [shape: f32[1,6], index: 1, kind: input, shape index: {}]   ;;  %s205_s2 = inlined_call_operand.<no memory space> [shape: f32[1], index: 2, kind: input, shape index: {}]   ;;  %s206_s3 = inlined_call_operand.hbm [shape: f32[1,128], index: 3, kind: output, shape index: {}]  }
   0x1   :  { %10 = vsyncpa [#allocation6], 0 }
   0x2   :  { %11 = vsyncpa [#allocation5], 0  ;;  %s17_s14 = sshll.u32 %s203_s0, 4  ;;  %s168_s15 = smov [#allocation3]   ;;  %s18_s14 = int_to_ptr.hbm [resolvable:$true] %s17_s14 }
   0x3   :  { %s19_s16 = sshll.u32 %s168_s15, 4  ;;  %s28_s19 = sshll.u32 %s204_s1, 4  ;;  %s20_s16 = int_to_ptr.vmem [resolvable:$true] %s19_s16  ;;  %s29_s19 = int_to_ptr.vmem [resolvable:$true] %s28_s19 }
   0x4   :  { %22 = dma.hbm_to_vmem [thread:$0]  %s18_s14, 128, %s20_s16, [#allocation4]  }
   0x5   :  { %s169_s20 = smov [#allocation7]  }
   0x6   :  { %31 = dma.vmem_to_smem %s29_s19, 16, %s169_s20, [#allocation6]  }
   0x7   :  { %162 = dma.done.wait [#allocation4], 128  }
   0x8   :  { %163 = vsyncadd [#allocation4], 4294967168 }
   0x9   :  { %164 = dma.done.wait [#allocation6], 16  }
   0xa   :  { %165 = vsyncadd [#allocation6], 4294967280 }
   0xb   :  { %42 = sfence }
   0xc   :  { %s44_s21 = sld [smem:[#allocation7]]  ;;  %v43_v0 = vld [vmem:[#allocation3] sm:$0x1]  ;;  %v47_v1 = vld [vmem:[#allocation3 + $0x1] sm:$0x1]  ;;  %v73_v22 = vstv %s205_s2  ;;  %s170_s27 = smov [#allocation8]  }
   0xd   :  { %s94_s22 = sld [smem:[#allocation7 + $0x1]]  ;;  %v52_v3 = vld [vmem:[#allocation3 + $0x2] sm:$0x1]  ;;  %v57_v6 = vld [vmem:[#allocation3 + $0x3] sm:$0x1]  ;;  %s81_s28 = sshll.u32 %s170_s27, 4  ;;  %s82_s28 = int_to_ptr.vmem [resolvable:$true] %s81_s28 }
   0xe   :  { %s95_s0 = sld [smem:[#allocation7 + $0x2]]  ;;  %v62_v11 = vld [vmem:[#allocation3 + $0x4] sm:$0x1]  ;;  %v67_v15 = vld [vmem:[#allocation3 + $0x5] sm:$0x1]  ;;  %s83_s4 = sshll.u32 %s206_s3, 4  ;;  %s84_s4 = int_to_ptr.hbm [resolvable:$true] %s83_s4 }
   0xf   :  { %s96_s23 = sld [smem:[#allocation7 + $0x3]] }
  0x10   :  { %s97_s24 = sld [smem:[#allocation7 + $0x4]] }
  0x11   :  { %s98_s25 = sld [smem:[#allocation7 + $0x5]] }
  0x12   :  { %v45_v2 = vstv %s44_s21 }
  0x13   :  { %v46_v4 = vmul.f32 %v45_v2, %v43_v0  ;;  %v49_v5 = vstv %s94_s22 }
  0x14   :  { %v50_v7 = vmul.f32 %v49_v5, %v47_v1  ;;  %v54_v8 = vstv %s95_s0 }
  0x15   :  { %v55_v9 = vmul.f32 %v54_v8, %v52_v3  ;;  %v59_v10 = vstv %s96_s23 }
  0x16   :  { %v51_v12 = vadd.f32 %v50_v7, %v46_v4  ;;  %v60_v13 = vmul.f32 %v59_v10, %v57_v6  ;;  %v64_v14 = vstv %s97_s24 }
  0x17   :  { %v69_v16 = vstv %s98_s25  ;;  %v65_v18 = vmul.f32 %v64_v14, %v62_v11 }
  0x18   :  { %v56_v17 = vadd.f32 %v55_v9, %v51_v12  ;;  %v70_v20 = vmul.f32 %v69_v16, %v67_v15 }
  0x1a   :  { %v61_v19 = vadd.f32 %v60_v13, %v56_v17 }
  0x1c   :  { %v66_v21 = vadd.f32 %v65_v18, %v61_v19 }
  0x1e   :  { %v71_v23 = vadd.f32 %v70_v20, %v66_v21 }
  0x20   :  { %v74_v24 = vadd.f32 %v73_v22, %v71_v23 }
  0x22   :  { %75 = vst [vmem:[#allocation8] sm:$0x1] %v74_v24 }
  0x23   :  { %86 = dma.vmem_to_hbm [thread:$0]  %s82_s28, 16, %s84_s4, [#allocation5]  }
  0x24   :  { %166 = dma.done.wait [#allocation5], 16  }
  0x25   :  { %167 = vsyncadd [#allocation5], 4294967280 }
  0x26   :  { %91 = vsyncpa [#allocation4], 1 }
  0x27   :  { %92 = vsyncpa [#allocation5], 1 }
  0x28   :  { %93 = vsyncpa [#allocation6], 1 }

</bundles_post_ra>
